<compile_context>
chip_gen: v7x
topology: tpu7x:2x2x1
jax: 0.10.0
libtpu: 0.0.40
codegen_flags: <defaults>
</compile_context>

<pallas_src>
import jax
import jax.numpy as jnp
from jax.experimental import pallas as pl
from jax.experimental.pallas import tpu as pltpu


_LANE = 128      # vreg lane width
_SUBLANE = 8     # vreg sublane count (f32)


def _round_up(x, m):
    return ((x + m - 1) // m) * m


def _linear_head_kernel(x_ref, w_ref, b_ref, o_ref):
    # Hot path: MXU matmul with f32 accumulation + f32 bias add, then cast.
    acc = jnp.dot(x_ref[...], w_ref[...], preferred_element_type=jnp.float32)
    o_ref[...] = (acc + b_ref[...].astype(jnp.float32)).astype(o_ref.dtype)


def _choose_tm(m_tokens, d, c_pad, dtype_bytes,
               vmem_budget_bytes=12 * 1024 * 1024):
    """Largest sublane-multiple token tile that fits a conservative VMEM budget.

    Budget model:
      resident (no re-DMA per step): W (D, C_pad) + bias (1, C_pad)
      double-buffered per token row: X row (D) + Y row (C_pad)
    12 MiB keeps us safely under the 16 MiB default scoped VMEM on v5e and
    well under v6e/v7x limits, so no vmem_limit_bytes override is needed.
    """
    resident = (d * c_pad + c_pad) * dtype_bytes
    per_row = 2 * (d + c_pad) * dtype_bytes
    tm = max(0, vmem_budget_bytes - resident) // max(per_row, 1)
    tm = max(_SUBLANE, (tm // _SUBLANE) * _SUBLANE)
    tm = min(tm, 1024)  # per-step-overhead amortization saturates around here
    tm = min(tm, _round_up(m_tokens, _SUBLANE))
    return tm


def decoder_linear_head(x_flat, weight_t, bias):
    """x_flat: (M, D), weight_t: (D, C), bias: (C,) -> (M, C)."""
    M, D = x_flat.shape
    _, C = weight_t.shape
    dtype = x_flat.dtype
    dtype_bytes = jnp.dtype(dtype).itemsize

    # Lane-dense class dimension: pad to a multiple of 128 (zeros).
    C_pad = _round_up(C, _LANE)
    TM = _choose_tm(M, D, C_pad, dtype_bytes)
    M_pad = _round_up(M, TM)

    x_p = x_flat if M_pad == M else jnp.pad(x_flat, ((0, M_pad - M), (0, 0)))
    w_p = weight_t if C_pad == C else jnp.pad(weight_t, ((0, 0), (0, C_pad - C)))
    b_p = bias if C_pad == C else jnp.pad(bias, ((0, C_pad - C),))
    b2d = b_p.reshape(1, C_pad)

    grid = (M_pad // TM,)
    cost = pl.CostEstimate(
        flops=2 * M_pad * D * C_pad,
        bytes_accessed=dtype_bytes * (M_pad * D + D * C_pad + C_pad + M_pad * C_pad),
        transcendentals=0,
    )

    y = pl.pallas_call(
        _linear_head_kernel,
        out_shape=jax.ShapeDtypeStruct((M_pad, C_pad), dtype),
        grid_spec=pltpu.PrefetchScalarGridSpec(
            num_scalar_prefetch=0,
            grid=grid,
            in_specs=[
                # X: streamed tile over the token axis (pipelined).
                pl.BlockSpec((TM, D), lambda i: (i, 0)),
                # W: resident across the grid (constant block index).
                pl.BlockSpec((D, C_pad), lambda i: (0, 0)),
                # bias: resident across the grid.
                pl.BlockSpec((1, C_pad), lambda i: (0, 0)),
            ],
            out_specs=pl.BlockSpec((TM, C_pad), lambda i: (i, 0)),
        ),
        compiler_params=pltpu.CompilerParams(
            # Token tiles are independent -> shard across TCs on v7x;
            # neutral on single-TC v5e/v6e.
            dimension_semantics=("parallel",),
        ),
        cost_estimate=cost,
    )(x_p, w_p, b2d)

    # Slice away the padding (tokens + classes) before any layout rearrange.
    return y[:M, :C]


def decoder_linear_forward(x, im_size, patch_size, weight, bias):
    """Full DecoderLinear.forward.

    x      : (B, N, d_encoder)
    weight : (n_cls, d_encoder)  (torch nn.Linear convention)
    bias   : (n_cls,)
    returns: (B, n_cls, GS, N // GS) with GS = H // patch_size
    """
    H, W = im_size
    GS = H // patch_size
    B, N, D = x.shape
    n_cls = weight.shape[0]

    x_flat = x.reshape(B * N, D)
    w_t = weight.T                      # (D, n_cls)

    y = decoder_linear_head(x_flat, w_t, bias)        # (B*N, n_cls)
    y = y.reshape(B, N, n_cls)                        # b (h w) c
    # rearrange 'b (h w) c -> b c h w'  (layout plumbing stays in XLA)
    y = y.reshape(B, GS, N // GS, n_cls)              # b h w c
    y = jnp.transpose(y, (0, 3, 1, 2))                # b c h w
    return y


if __name__ == "__main__":
    # Small, consistent shapes:
    #   batch=2, d_encoder=32, patch_size=4, image 16x16 -> GS=4, N=16 tokens
    #   n_cls=8
    B = 2
    d_encoder = 32
    patch_size = 4
    H = W = 16
    GS = H // patch_size
    N = GS * (W // patch_size)   # 16
    n_cls = 8

    key = jax.random.PRNGKey(0)
    kx, kw, kb = jax.random.split(key, 3)

    x = jax.random.normal(kx, (B, N, d_encoder), dtype=jnp.float32)
    # Deterministic synthetic parameters (init_weights_2 ~ trunc_normal; we use
    # a plain normal scaled down — shapes match nn.Linear(d_encoder, n_cls)).
    weight = jax.random.normal(kw, (n_cls, d_encoder), dtype=jnp.float32) * 0.02
    bias = jax.random.normal(kb, (n_cls,), dtype=jnp.float32) * 0.02

    out = decoder_linear_forward(x, (H, W), patch_size, weight, bias)
    out = jax.block_until_ready(out)

    # Reference check in plain JAX (same math as torch F.linear + rearrange).
    ref = jnp.einsum("bnd,cd->bnc", x, weight) + bias
    ref = jnp.transpose(ref.reshape(B, GS, N // GS, n_cls), (0, 3, 1, 2))
    assert out.shape == (B, n_cls, GS, GS), out.shape
    assert jnp.allclose(out, ref, atol=1e-5, rtol=1e-5)

    print("KERNEL_OK")
</pallas_src>

<mosaic_0001>
module attributes {stable_mosaic.version = 11 : i64} {
  func.func @_linear_head_kernel(%arg0: i32, %arg1: memref<32x32xf32, #tpu.memory_space<vmem>>, %arg2: memref<32x128xf32, #tpu.memory_space<vmem>>, %arg3: memref<1x128xf32, #tpu.memory_space<vmem>>, %arg4: memref<32x128xf32, #tpu.memory_space<vmem>>) attributes {dimension_semantics = [#tpu.dimension_semantics<parallel>], iteration_bounds = array<i64: 1>, scalar_prefetch = 0 : i64, scratch_operands = 0 : i64, tpu.core_type = #tpu.core_type<tc>, window_params = [{transform_indices = @transform_0, window_bounds = array<i64: 32, 32>}, {pipeline_mode = #tpu.pipeline_mode<synchronous>, transform_indices = @transform_1, window_bounds = array<i64: 32, 128>}, {pipeline_mode = #tpu.pipeline_mode<synchronous>, transform_indices = @transform_2, window_bounds = array<i64: 1, 128>}, {transform_indices = @transform_3, window_bounds = array<i64: 32, 128>}]} {
    %c0 = arith.constant 0 : index
    %c0_0 = arith.constant 0 : index
    %0 = vector.load %arg1[%c0, %c0_0] : memref<32x32xf32, #tpu.memory_space<vmem>>, vector<32x32xf32>
    %c0_1 = arith.constant 0 : index
    %c0_2 = arith.constant 0 : index
    %1 = vector.load %arg2[%c0_1, %c0_2] : memref<32x128xf32, #tpu.memory_space<vmem>>, vector<32x128xf32>
    %cst = arith.constant dense<0.000000e+00> : vector<32x128xf32>
    %2 = tpu.matmul %0, %1, %cst {dimension_numbers = #tpu.dot_dimension_numbers<[1], [0], [0], [1], [0, 0, 1, 1], [], []>} : vector<32x32xf32>, vector<32x128xf32>, vector<32x128xf32> -> vector<32x128xf32>
    %c0_3 = arith.constant 0 : index
    %c0_4 = arith.constant 0 : index
    %3 = vector.load %arg3[%c0_3, %c0_4] : memref<1x128xf32, #tpu.memory_space<vmem>>, vector<1x128xf32>
    %4 = vector.broadcast %3 : vector<1x128xf32> to vector<32x128xf32>
    %5 = arith.addf %2, %4 : vector<32x128xf32>
    %c0_5 = arith.constant 0 : index
    %c0_6 = arith.constant 0 : index
    %6 = vector.load %arg4[%c0_5, %c0_6] : memref<32x128xf32, #tpu.memory_space<vmem>>, vector<32x128xf32>
    tpu.vector_store %arg4[%c0_5, %c0_6], %5 {strides = array<i32>} : memref<32x128xf32, #tpu.memory_space<vmem>>, vector<32x128xf32>,
    return
  }
  func.func @transform_0(%arg0: i32) -> (i32, i32) {
    %c0_i32 = arith.constant 0 : i32
    %c0_i32_0 = arith.constant 0 : i32
    return %arg0, %c0_i32 : i32, i32
  }
  func.func @transform_1(%arg0: i32) -> (i32, i32) {
    %c0_i32 = arith.constant 0 : i32
    %c0_i32_0 = arith.constant 0 : i32
    %c0_i32_1 = arith.constant 0 : i32
    return %c0_i32, %c0_i32_0 : i32, i32
  }
  func.func @transform_2(%arg0: i32) -> (i32, i32) {
    %c0_i32 = arith.constant 0 : i32
    %c0_i32_0 = arith.constant 0 : i32
    %c0_i32_1 = arith.constant 0 : i32
    return %c0_i32, %c0_i32_0 : i32, i32
  }
  func.func @transform_3(%arg0: i32) -> (i32, i32) {
    %c0_i32 = arith.constant 0 : i32
    %c0_i32_0 = arith.constant 0 : i32
    return %arg0, %c0_i32 : i32, i32
  }
}

</mosaic_0001>

<bundles_post_ra>
// kernel: tpu_custom_call.1
= control target key start
LH: loop header
LB: loop body
LE: loop exit
PB: predicated region body
PF: predicated region fallthrough
CT: control target
= control target key end

     0   :  { %8 = vsyncpa [#allocation3], 0  ;;  %s371_s0 = inlined_call_operand.hbm [shape: f32[32,32], index: 0, kind: input, shape index: {}]   ;;  %s372_s1 = inlined_call_operand.hbm [shape: f32[32,128], index: 1, kind: input, shape index: {}]   ;;  %s373_s2 = inlined_call_operand.vmem [shape: f32[1,128], index: 2, kind: input, shape index: {}]   ;;  %s374_s3 = inlined_call_operand.hbm [shape: f32[32,128], index: 3, kind: output, shape index: {}]  }
   0x1   :  { %9 = vsyncpa [#allocation6], 0 }
   0x2   :  { %10 = vsyncpa [#allocation4], 0  ;;  %s294_s12 = smov [#allocation2]   ;;  %s222_s16 = scalar_lea.hbm %s371_s0, 512 }
   0x3   :  { %s16_s13 = sshll.u32 %s294_s12, 4  ;;  %p223_p0 = scmp.ne.s32.totalorder %s371_s0, %s222_s16  ;;  %s17_s13 = int_to_ptr.vmem [resolvable:$true] %s16_s13 }
   0x4   :  { %p226_p1 = scmp.lt.u32.totalorder %s222_s16, %s371_s0 }
   0x6   :  { %p228_p2 = pnand %p226_p1, %p223_p0 }
   0x8   :  { %231 = shalt.err (!%p228_p2)
}
   0x9   :  { %s232_s21 = scalar_lea.vmem %s17_s13, 512  ;;  %p237_p4 = scmp.lt.s32.totalorder %s17_s13, %s17_s13 }
   0xa   :  { %p233_p3 = scmp.ne.s32.totalorder %s17_s13, %s232_s21  ;;  %p238_p5 = scmp.lt.s32.totalorder %s232_s21, %s232_s21 }
   0xc   :  { %p239_p6 = por %p238_p5, %p237_p4 }
   0xe   :  { %p240_p7 = pnand %p239_p6, %p233_p3 }
  0x10   :  { %243 = shalt.err (!%p240_p7)
}
  0x11   :  { %s295_s22 = smov 128   ;;  %s296_s23 = smov 8  }
  0x12   :  { %22 = dma.hbm_to_vmem [thread:$0]  %s371_s0, 512, %s17_s13, [#allocation3], %s295_s22, %s295_s22, %s296_s23  }
  0x13   :  { %s297_s26 = smov [#allocation5]   ;;  %s244_s30 = scalar_lea.hbm %s372_s1, 512 }
  0x14   :  { %s28_s27 = sshll.u32 %s297_s26, 4  ;;  %p245_p8 = scmp.ne.s32.totalorder %s372_s1, %s244_s30  ;;  %s29_s27 = int_to_ptr.vmem [resolvable:$true] %s28_s27 }
  0x15   :  { %p248_p9 = scmp.lt.u32.totalorder %s244_s30, %s372_s1 }
  0x17   :  { %p250_p10 = pnand %p248_p9, %p245_p8 }
  0x19   :  { %253 = shalt.err (!%p250_p10)
}
  0x1a   :  { %s254_s8 = scalar_lea.vmem %s29_s27, 512  ;;  %p259_p12 = scmp.lt.s32.totalorder %s29_s27, %s29_s27 }
  0x1b   :  { %p255_p11 = scmp.ne.s32.totalorder %s29_s27, %s254_s8  ;;  %p260_p13 = scmp.lt.s32.totalorder %s254_s8, %s254_s8 }
  0x1d   :  { %p261_p0 = por %p260_p13, %p259_p12 }
  0x1f   :  { %p262_p1 = pnand %p261_p0, %p255_p11 }
  0x21   :  { %265 = shalt.err (!%p262_p1)
}
  0x22   :  { %34 = dma.hbm_to_vmem [thread:$0]  %s372_s1, 512, %s29_s27, [#allocation6], %s295_s22, %s295_s22, %s296_s23  }
  0x23   :  { %288 = dma.done.wait [#allocation3], 512  }
  0x24   :  { %289 = vsyncadd [#allocation3], 4294966784 }
  0x25   :  { %290 = dma.done.wait [#allocation6], 512  }
  0x26   :  { %291 = vsyncadd [#allocation6], 4294966784  ;;  %vm58_vm0 = vcmask 261120   ;;  %v47_v0 = vld [vmem:[#allocation5] sm:$0xff]  ;;  %v48_v1 = vld [vmem:[#allocation5 + $0x8] sm:$0xff]  ;;  %s298_s11 = smov [#allocation7]  }
  0x27   :  { %v49_v2 = vld [vmem:[#allocation5 + $0x10] sm:$0xff]  ;;  %v205_v3 = vpack.c.bf16 %v48_v1, %v47_v0  ;;  %v50_v4 = vld [vmem:[#allocation5 + $0x18] sm:$0xff]  ;;  %v43_v5 = vld [vmem:[#allocation2] sm:$0xff]  ;;  %s165_s12 = sshll.u32 %s298_s11, 4  ;;  %s166_s12 = int_to_ptr.vmem [resolvable:$true] %s165_s12 }
  0x28   :  { %v45_v6 = vld [vmem:[#allocation2 + $0x10] sm:$0xff]  ;;  %v209_v7 = vpack.c.bf16 %v50_v4, %v49_v2  ;;  %199 = vmatprep.mubr.msk.f32.mxu0 %vm58_vm0, %v43_v5  ;;  %v44_v8 = vld [vmem:[#allocation2 + $0x8] sm:$0xff]  ;;  %v46_v9 = vld [vmem:[#allocation2 + $0x18] sm:$0xff]  ;;  %s266_s13 = scalar_lea.vmem %s166_s12, 512  ;;  %p271_p3 = scmp.lt.s32.totalorder %s166_s12, %s166_s12 }
  0x29   :  { %202 = vmatprep.mubr.msk.f32.mxu1 %vm58_vm0, %v45_v6  ;;  %206 = vmatprep.subr.bf16.mxu0 %v205_v3  ;;  %v178_v10 = vld [vmem:[%s373_s2] ss:$0 sm:$0xff]  ;;  %p267_p2 = scmp.ne.s32.totalorder %s166_s12, %s266_s13  ;;  %p272_p4 = scmp.lt.s32.totalorder %s266_s13, %s266_s13 }
  0x2a   :  { %213 = vmatprep.subr.bf16.mxu1 %v205_v3  ;;  %208 = vmatpush3.bf16.msra.mxu0 %v205_v3 }
  0x2b   :  { %215 = vmatpush3.bf16.msra.mxu1 %v205_v3  ;;  %210 = vmatprep.subr.bf16.mxu0 %v209_v7  ;;  %p273_p5 = por %p272_p4, %p271_p3 }
  0x2c   :  { %214 = vmatprep.subr.bf16.mxu1 %v209_v7 }
  0x2d   :  { %p274_p6 = pnand %p273_p5, %p267_p2 }
  0x2e   :  { %212 = vmatpush3.bf16.msra.mxu0 %v209_v7 }
  0x2f   :  { %216 = vmatpush3.bf16.msra.mxu1 %v209_v7 }
  0x31   :  { %200 = vmatmul.mubr.msk.f32.vlgmr.msra.gmra.mrb[0].mxu0 %vm58_vm0, %v44_v8 }
  0x32   :  { %203 = vmatmul.mubr.msk.f32.vlgmr.msra.gmra.mrb[0].mxu1 %vm58_vm0, %v46_v9 }
 0x104   :  { %v201_v11 = vpop.f32.mrb[0].mxu0 }
 0x105   :  { %v204_v12 = vpop.f32.mrb[0].mxu1  ;;  %v143_v13 = vadd.f32 %v201_v11, %v178_v10  ;;  %v137_v15 = vpop.f32.mrb[1].mxu0 }
 0x106   :  { %v153_v14 = vadd.f32 %v204_v12, %v178_v10  ;;  %v147_v16 = vpop.f32.mrb[1].mxu1  ;;  %v138_v17 = vadd.f32 %v178_v10, %v137_v15 }
 0x107   :  { %v148_v18 = vadd.f32 %v178_v10, %v147_v16  ;;  %157 = vst [vmem:[#allocation7 + $0x8] sm:$0xff] %v143_v13 }
 0x108   :  { %159 = vst [vmem:[#allocation7 + $0x18] sm:$0xff] %v153_v14  ;;  %156 = vst [vmem:[#allocation7] sm:$0xff] %v138_v17 }
 0x109   :  { %158 = vst [vmem:[#allocation7 + $0x10] sm:$0xff] %v148_v18 }
 0x10a   :  { %277 = shalt.err (!%p274_p6)
}
 0x10b   :  { %s278_s15 = scalar_lea.hbm %s374_s3, 512 }
 0x10c   :  { %p279_p7 = scmp.ne.s32.totalorder %s374_s3, %s278_s15  ;;  %p282_p8 = scmp.lt.u32.totalorder %s278_s15, %s374_s3 }
 0x10e   :  { %p284_p9 = pnand %p282_p8, %p279_p7 }
 0x110   :  { %287 = shalt.err (!%p284_p9)
}
 0x111   :  { %171 = dma.vmem_to_hbm [thread:$0]  %s166_s12, 512, %s374_s3, [#allocation4], %s295_s22, %s295_s22, %s296_s23  }
 0x112   :  { %292 = dma.done.wait [#allocation4], 512  }
 0x113   :  { %293 = vsyncadd [#allocation4], 4294966784 }
 0x114   :  { %175 = vsyncpa [#allocation3], 1 }
 0x115   :  { %176 = vsyncpa [#allocation6], 1 }
 0x116   :  { %177 = vsyncpa [#allocation4], 1 }

</bundles_post_ra>
